<compile_context>
chip_gen: v6e
topology: v6e:2x2x1
jax: 0.10.0
libtpu: 0.0.40
codegen_flags: <defaults>
</compile_context>

<pallas_src>
import functools

import jax
import jax.numpy as jnp
from jax import lax
from jax.experimental import pallas as pl
from jax.experimental.pallas import tpu as pltpu


def _soft_clip_kernel(logits_row_ref, logits_col_ref, img_ref, txt_ref,
                      out_ref, *, tm, scale):
    i = pl.program_id(0)
    row_start = pl.multiple_of(i * tm, tm)

    # ---------------- image side: rows [row_start, row_start + tm) ----------
    # label_sim row tile: txt[rows] @ img.T, expressed as a dim-1/dim-1
    # contraction so no label transpose is materialized.
    txt_tile = txt_ref[pl.ds(row_start, tm), :]                      # (tm, Dp)
    sim_r = lax.dot_general(
        txt_tile, img_ref[...],
        dimension_numbers=(((1,), (1,)), ((), ())),
        preferred_element_type=jnp.float32)                          # (tm, B)

    lg_r = logits_row_ref[...].astype(jnp.float32)                   # (tm, B)
    z_r = lg_r - jnp.max(lg_r, axis=1, keepdims=True)
    lse_r = jnp.log(jnp.sum(jnp.exp(z_r), axis=1, keepdims=True))    # (tm, 1)

    e_sim = jnp.exp(sim_r - jnp.max(sim_r, axis=1, keepdims=True))   # (tm, B)
    s_sim = jnp.sum(e_sim, axis=1, keepdims=True)                    # (tm, 1)
    w_r = jnp.sum(e_sim * z_r, axis=1, keepdims=True)                # (tm, 1)

    # -sum(p * log_softmax(lg)) over this row tile, p = softmax(sim_r, 1):
    #   sum_i lse_i - sum_i (sum_j e_ij * z_ij) / s_i
    img_partial = jnp.sum(lse_r) - jnp.sum(w_r * pl.reciprocal(s_sim, approx=True))

    # ---------------- text side: columns [row_start, row_start + tm) --------
    # label_sim column tile: (B, tm); softmax over axis 0 (rows of sim.T).
    img_tile = img_ref[pl.ds(row_start, tm), :]                      # (tm, Dp)
    sim_c = lax.dot_general(
        txt_ref[...], img_tile,
        dimension_numbers=(((1,), (1,)), ((), ())),
        preferred_element_type=jnp.float32)                          # (B, tm)

    lg_c = logits_col_ref[...].astype(jnp.float32)                   # (B, tm)
    z_c = lg_c - jnp.max(lg_c, axis=0, keepdims=True)
    lse_c = jnp.log(jnp.sum(jnp.exp(z_c), axis=0, keepdims=True))    # (1, tm)

    e_simc = jnp.exp(sim_c - jnp.max(sim_c, axis=0, keepdims=True))  # (B, tm)
    s_simc = jnp.sum(e_simc, axis=0, keepdims=True)                  # (1, tm)
    w_c = jnp.sum(e_simc * z_c, axis=0, keepdims=True)               # (1, tm)

    txt_partial = jnp.sum(lse_c) - jnp.sum(w_c * pl.reciprocal(s_simc, approx=True))

    # scale = 0.5 / B folds the /B of soft_xent and the final /2.
    partial = (img_partial + txt_partial) * scale
    # Lane-dense splat store of the per-tile partial; wrapper reads [:, 0, 0].
    out_ref[...] = jnp.full((1, 8, 128), partial, dtype=jnp.float32)


def _vmem_limit_bytes():
    """Generation-aware VMEM budget (85% of physical; safe fallback 64 MiB)."""
    cap = None
    try:
        info = pltpu.get_tpu_info()
        cap = getattr(info, "vmem_capacity_bytes", None)
    except Exception:
        cap = None
    if not cap:
        cap = 64 * 1024 * 1024   # conservative: v7x per-TensorCore VMEM
    return int(cap * 0.85)


def _pick_row_tile(batch, feat, label_bytes, budget_bytes):
    """Largest 128-multiple divisor of `batch` whose per-step VMEM fits budget."""
    # Resident label matrices (worst case: double-buffered even though we
    # request single buffering for them).
    label_cost = 2 * 2 * batch * feat * label_bytes
    avail = max(budget_bytes - label_cost, 0)
    # Per row of a tile: 2 double-buffered f32 logits tiles (row + column
    # orientation) + ~5 live (tm, B) f32 temporaries  =>  ~9 * 4 * B bytes.
    per_row = 9 * 4 * batch
    tm_max = avail // per_row if per_row else batch
    # The (B, tm) column block needs tm to be a multiple of 128 (unless it
    # spans the full array), and tm must divide B.
    cands = [t for t in range(128, batch, 128) if batch % t == 0]
    for t in sorted(cands, reverse=True):
        if t <= tm_max:
            return t
    if cands:
        return min(cands)   # smallest tiled option; still better than full B
    return batch            # small / indivisible batch: single full-array tile


def soft_clip_loss(logits, img_labels, txt_labels, *, labels_in_bf16=True):
    B, Bc = logits.shape
    assert B == Bc, "logits must be square (B, B)"
    assert img_labels.shape[0] == B and txt_labels.shape[0] == B
    assert img_labels.shape[1] == txt_labels.shape[1]
    D = img_labels.shape[1]

    # Pad the label feature dim (MXU contraction K) up to a lane multiple;
    # zero columns are numerically exact for the dot products.
    Dp = max(128, ((D + 127) // 128) * 128)
    if Dp != D:
        pad = ((0, 0), (0, Dp - D))
        img_labels = jnp.pad(img_labels, pad)
        txt_labels = jnp.pad(txt_labels, pad)
    if labels_in_bf16:
        img_labels = img_labels.astype(jnp.bfloat16)
        txt_labels = txt_labels.astype(jnp.bfloat16)

    vmem_limit = _vmem_limit_bytes()
    label_bytes = jnp.dtype(img_labels.dtype).itemsize
    tm = _pick_row_tile(B, Dp, label_bytes, int(0.9 * vmem_limit))
    num_tiles = B // tm
    scale = 0.5 / float(B)

    kernel = functools.partial(_soft_clip_kernel, tm=tm, scale=scale)

    def build(single_buffer_labels):
        label_kwargs = {}
        if single_buffer_labels:
            # Constant index_map -> never re-fetched; one buffer is enough.
            label_kwargs = dict(pipeline_mode=pl.Buffered(1))
        return pl.pallas_call(
            kernel,
            out_shape=jax.ShapeDtypeStruct((num_tiles, 8, 128), jnp.float32),
            grid=(num_tiles,),
            in_specs=[
                pl.BlockSpec((tm, B), lambda i: (i, 0)),    # logits row tile
                pl.BlockSpec((B, tm), lambda i: (0, i)),    # logits column tile
                pl.BlockSpec((B, Dp), lambda i: (0, 0), **label_kwargs),  # img
                pl.BlockSpec((B, Dp), lambda i: (0, 0), **label_kwargs),  # txt
            ],
            out_specs=pl.BlockSpec((1, 8, 128), lambda i: (i, 0, 0)),
            compiler_params=pltpu.CompilerParams(
                # Per-tile partial outputs -> no cross-step accumulation, so
                # the axis is parallel (shards across v7x's 2 TensorCores).
                dimension_semantics=("parallel",),
                vmem_limit_bytes=vmem_limit,
            ),
        )

    try:
        partials = build(True)(logits, logits, img_labels, txt_labels)
    except Exception:
        # Fallback if single-buffered label inputs (pl.Buffered(1)) are not
        # supported by the installed Pallas version.
        partials = build(False)(logits, logits, img_labels, txt_labels)

    return jnp.sum(partials[:, 0, 0])


def _reference_soft_clip_loss(logits, img_labels, txt_labels):
    # Pure-JAX reference mirroring the PyTorch module (matmul at HIGHEST
    # precision so the comparison measures the kernel, not XLA's default
    # bf16-pass matmul).
    def soft_xent(x, y):
        logprobs = jax.nn.log_softmax(x, axis=1)
        return -jnp.sum(y * logprobs) / x.shape[0]

    label_sim = jnp.matmul(txt_labels, img_labels.T,
                           precision=jax.lax.Precision.HIGHEST)
    img_loss = soft_xent(logits, jax.nn.softmax(label_sim, axis=1))
    txt_loss = soft_xent(logits.T, jax.nn.softmax(label_sim.T, axis=1))
    return (img_loss + txt_loss) / 2.0


def _run_case(key, B, D, labels_in_bf16, rtol=5e-3, atol=5e-3):
    k1, k2, k3 = jax.random.split(key, 3)
    logits = jax.random.normal(k1, (B, B), dtype=jnp.float32)
    img_labels = jax.random.normal(k2, (B, D), dtype=jnp.float32)
    txt_labels = jax.random.normal(k3, (B, D), dtype=jnp.float32)

    loss = soft_clip_loss(logits, img_labels, txt_labels,
                          labels_in_bf16=labels_in_bf16)
    loss = jax.block_until_ready(loss)

    if labels_in_bf16:
        # Compare against the reference on bf16-rounded labels so the check
        # measures kernel correctness, not the (intentional) bf16 cast.
        img_ref = img_labels.astype(jnp.bfloat16).astype(jnp.float32)
        txt_ref = txt_labels.astype(jnp.bfloat16).astype(jnp.float32)
    else:
        img_ref, txt_ref = img_labels, txt_labels
    ref = _reference_soft_clip_loss(logits, img_ref, txt_ref)
    assert jnp.allclose(loss, ref, rtol=rtol, atol=atol), (B, D, loss, ref)


if __name__ == "__main__":
    key = jax.random.PRNGKey(0)
    k_small, k_tiled = jax.random.split(key)

    # Small single-tile case (B = 8, D = 32), exact f32 label path.
    _run_case(k_small, B=8, D=32, labels_in_bf16=False)

    # Multi-tile case: parallel row/column-tiled grid, per-tile partial
    # outputs, bf16-label MXU path, D padded 64 -> 128.
    _run_case(k_tiled, B=256, D=64, labels_in_bf16=True)

    print("KERNEL_OK")
</pallas_src>

<mosaic_0001>
module attributes {stable_mosaic.version = 11 : i64} {
  func.func @_soft_clip_kernel(%arg0: i32, %arg1: memref<8x8xf32, #tpu.memory_space<vmem>>, %arg2: memref<8x8xf32, #tpu.memory_space<vmem>>, %arg3: memref<8x128xf32, #tpu.memory_space<vmem>>, %arg4: memref<8x128xf32, #tpu.memory_space<vmem>>, %arg5: memref<1x8x128xf32, #tpu.memory_space<vmem>>) attributes {dimension_semantics = [#tpu.dimension_semantics<parallel>], iteration_bounds = array<i64: 1>, scalar_prefetch = 0 : i64, scratch_operands = 0 : i64, tpu.core_type = #tpu.core_type<tc>, window_params = [{transform_indices = @transform_0, window_bounds = array<i64: 8, 8>}, {transform_indices = @transform_1, window_bounds = array<i64: 8, 8>}, {pipeline_mode = #tpu.pipeline_mode<synchronous>, transform_indices = @transform_2, window_bounds = array<i64: 8, 128>}, {pipeline_mode = #tpu.pipeline_mode<synchronous>, transform_indices = @transform_3, window_bounds = array<i64: 8, 128>}, {transform_indices = @transform_4, window_bounds = array<i64: 1, 8, 128>}]} {
    %c8_i32 = arith.constant 8 : i32
    %0 = arith.muli %arg0, %c8_i32 : i32
    %1 = tpu.assume_multiple %0, 8 : i32
    %2 = arith.index_cast %1 : i32 to index
    %c0 = arith.constant 0 : index
    %3 = vector.load %arg4[%2, %c0] : memref<8x128xf32, #tpu.memory_space<vmem>>, vector<8x128xf32>
    %c0_0 = arith.constant 0 : index
    %c0_1 = arith.constant 0 : index
    %4 = vector.load %arg3[%c0_0, %c0_1] : memref<8x128xf32, #tpu.memory_space<vmem>>, vector<8x128xf32>
    %cst = arith.constant dense<0.000000e+00> : vector<8x8xf32>
    %5 = tpu.matmul %3, %4, %cst {dimension_numbers = #tpu.dot_dimension_numbers<[1], [1], [0], [0], [0, 0, 1, 0], [], []>} : vector<8x128xf32>, vector<8x128xf32>, vector<8x8xf32> -> vector<8x8xf32>
    %c0_2 = arith.constant 0 : index
    %c0_3 = arith.constant 0 : index
    %6 = vector.load %arg1[%c0_2, %c0_3] : memref<8x8xf32, #tpu.memory_space<vmem>>, vector<8x8xf32>
    %cst_4 = arith.constant dense<0xFF800000> : vector<8xf32>
    %7 = vector.multi_reduction <maximumf>, %6, %cst_4 [1] : vector<8x8xf32> to vector<8xf32>
    %8 = vector.shape_cast %7 : vector<8xf32> to vector<8x1xf32>
    %9 = vector.broadcast %8 : vector<8x1xf32> to vector<8x8xf32>
    %10 = arith.subf %6, %9 : vector<8x8xf32>
    %11 = math.exp %10 : vector<8x8xf32>
    %cst_5 = arith.constant dense<0.000000e+00> : vector<8xf32>
    %12 = vector.multi_reduction <add>, %11, %cst_5 [1] : vector<8x8xf32> to vector<8xf32>
    %13 = vector.shape_cast %12 : vector<8xf32> to vector<8x1xf32>
    %14 = math.log %13 : vector<8x1xf32>
    %cst_6 = arith.constant dense<0xFF800000> : vector<8xf32>
    %15 = vector.multi_reduction <maximumf>, %5, %cst_6 [1] : vector<8x8xf32> to vector<8xf32>
    %16 = vector.shape_cast %15 : vector<8xf32> to vector<8x1xf32>
    %17 = vector.broadcast %16 : vector<8x1xf32> to vector<8x8xf32>
    %18 = arith.subf %5, %17 : vector<8x8xf32>
    %19 = math.exp %18 : vector<8x8xf32>
    %cst_7 = arith.constant dense<0.000000e+00> : vector<8xf32>
    %20 = vector.multi_reduction <add>, %19, %cst_7 [1] : vector<8x8xf32> to vector<8xf32>
    %21 = vector.shape_cast %20 : vector<8xf32> to vector<8x1xf32>
    %22 = arith.mulf %19, %10 : vector<8x8xf32>
    %cst_8 = arith.constant dense<0.000000e+00> : vector<8xf32>
    %23 = vector.multi_reduction <add>, %22, %cst_8 [1] : vector<8x8xf32> to vector<8xf32>
    %24 = vector.shape_cast %23 : vector<8xf32> to vector<8x1xf32>
    %25 = vector.shape_cast %14 : vector<8x1xf32> to vector<1x8x1xf32>
    %cst_9 = arith.constant dense<0.000000e+00> : vector<1xf32>
    %26 = vector.multi_reduction <add>, %25, %cst_9 [1, 2] : vector<1x8x1xf32> to vector<1xf32>
    %27 = vector.shape_cast %26 : vector<1xf32> to vector<1x1x1xf32>
    %28 = vector.extract %27[0, 0, 0] : f32 from vector<1x1x1xf32>
    %29 = tpu.reciprocal %21 {approx = true} : vector<8x1xf32> -> vector<8x1xf32>
    %30 = arith.mulf %24, %29 : vector<8x1xf32>
    %31 = vector.shape_cast %30 : vector<8x1xf32> to vector<1x8x1xf32>
    %cst_10 = arith.constant dense<0.000000e+00> : vector<1xf32>
    %32 = vector.multi_reduction <add>, %31, %cst_10 [1, 2] : vector<1x8x1xf32> to vector<1xf32>
    %33 = vector.shape_cast %32 : vector<1xf32> to vector<1x1x1xf32>
    %34 = vector.extract %33[0, 0, 0] : f32 from vector<1x1x1xf32>
    %35 = arith.subf %28, %34 : f32
    %36 = arith.index_cast %1 : i32 to index
    %c0_11 = arith.constant 0 : index
    %37 = vector.load %arg3[%36, %c0_11] : memref<8x128xf32, #tpu.memory_space<vmem>>, vector<8x128xf32>
    %c0_12 = arith.constant 0 : index
    %c0_13 = arith.constant 0 : index
    %38 = vector.load %arg4[%c0_12, %c0_13] : memref<8x128xf32, #tpu.memory_space<vmem>>, vector<8x128xf32>
    %cst_14 = arith.constant dense<0.000000e+00> : vector<8x8xf32>
    %39 = tpu.matmul %38, %37, %cst_14 {dimension_numbers = #tpu.dot_dimension_numbers<[1], [1], [0], [0], [0, 0, 1, 0], [], []>} : vector<8x128xf32>, vector<8x128xf32>, vector<8x8xf32> -> vector<8x8xf32>
    %c0_15 = arith.constant 0 : index
    %c0_16 = arith.constant 0 : index
    %40 = vector.load %arg2[%c0_15, %c0_16] : memref<8x8xf32, #tpu.memory_space<vmem>>, vector<8x8xf32>
    %cst_17 = arith.constant dense<0xFF800000> : vector<8xf32>
    %41 = vector.multi_reduction <maximumf>, %40, %cst_17 [0] : vector<8x8xf32> to vector<8xf32>
    %42 = vector.shape_cast %41 : vector<8xf32> to vector<1x8xf32>
    %43 = vector.broadcast %42 : vector<1x8xf32> to vector<8x8xf32>
    %44 = arith.subf %40, %43 : vector<8x8xf32>
    %45 = math.exp %44 : vector<8x8xf32>
    %cst_18 = arith.constant dense<0.000000e+00> : vector<8xf32>
    %46 = vector.multi_reduction <add>, %45, %cst_18 [0] : vector<8x8xf32> to vector<8xf32>
    %47 = vector.shape_cast %46 : vector<8xf32> to vector<1x8xf32>
    %48 = math.log %47 : vector<1x8xf32>
    %cst_19 = arith.constant dense<0xFF800000> : vector<8xf32>
    %49 = vector.multi_reduction <maximumf>, %39, %cst_19 [0] : vector<8x8xf32> to vector<8xf32>
    %50 = vector.shape_cast %49 : vector<8xf32> to vector<1x8xf32>
    %51 = vector.broadcast %50 : vector<1x8xf32> to vector<8x8xf32>
    %52 = arith.subf %39, %51 : vector<8x8xf32>
    %53 = math.exp %52 : vector<8x8xf32>
    %cst_20 = arith.constant dense<0.000000e+00> : vector<8xf32>
    %54 = vector.multi_reduction <add>, %53, %cst_20 [0] : vector<8x8xf32> to vector<8xf32>
    %55 = vector.shape_cast %54 : vector<8xf32> to vector<1x8xf32>
    %56 = arith.mulf %53, %44 : vector<8x8xf32>
    %cst_21 = arith.constant dense<0.000000e+00> : vector<8xf32>
    %57 = vector.multi_reduction <add>, %56, %cst_21 [0] : vector<8x8xf32> to vector<8xf32>
    %58 = vector.shape_cast %57 : vector<8xf32> to vector<1x8xf32>
    %59 = vector.shape_cast %48 : vector<1x8xf32> to vector<1x1x8xf32>
    %cst_22 = arith.constant dense<0.000000e+00> : vector<1xf32>
    %60 = vector.multi_reduction <add>, %59, %cst_22 [1, 2] : vector<1x1x8xf32> to vector<1xf32>
    %61 = vector.shape_cast %60 : vector<1xf32> to vector<1x1x1xf32>
    %62 = vector.extract %61[0, 0, 0] : f32 from vector<1x1x1xf32>
    %63 = tpu.reciprocal %55 {approx = true} : vector<1x8xf32> -> vector<1x8xf32>
    %64 = arith.mulf %58, %63 : vector<1x8xf32>
    %65 = vector.shape_cast %64 : vector<1x8xf32> to vector<1x1x8xf32>
    %cst_23 = arith.constant dense<0.000000e+00> : vector<1xf32>
    %66 = vector.multi_reduction <add>, %65, %cst_23 [1, 2] : vector<1x1x8xf32> to vector<1xf32>
    %67 = vector.shape_cast %66 : vector<1xf32> to vector<1x1x1xf32>
    %68 = vector.extract %67[0, 0, 0] : f32 from vector<1x1x1xf32>
    %69 = arith.subf %62, %68 : f32
    %70 = arith.addf %35, %69 : f32
    %cst_24 = arith.constant 6.250000e-02 : f32
    %71 = arith.mulf %70, %cst_24 : f32
    %72 = vector.broadcast %71 : f32 to vector<1x8x128xf32>
    %c0_25 = arith.constant 0 : index
    %c0_26 = arith.constant 0 : index
    %c0_27 = arith.constant 0 : index
    %73 = vector.load %arg5[%c0_25, %c0_26, %c0_27] : memref<1x8x128xf32, #tpu.memory_space<vmem>>, vector<1x8x128xf32>
    tpu.vector_store %arg5[%c0_25, %c0_26, %c0_27], %72 {strides = array<i32>} : memref<1x8x128xf32, #tpu.memory_space<vmem>>, vector<1x8x128xf32>,
    return
  }
  func.func @transform_0(%arg0: i32) -> (i32, i32) {
    %c0_i32 = arith.constant 0 : i32
    %c0_i32_0 = arith.constant 0 : i32
    return %arg0, %c0_i32 : i32, i32
  }
  func.func @transform_1(%arg0: i32) -> (i32, i32) {
    %c0_i32 = arith.constant 0 : i32
    %c0_i32_0 = arith.constant 0 : i32
    return %c0_i32, %arg0 : i32, i32
  }
  func.func @transform_2(%arg0: i32) -> (i32, i32) {
    %c0_i32 = arith.constant 0 : i32
    %c0_i32_0 = arith.constant 0 : i32
    %c0_i32_1 = arith.constant 0 : i32
    return %c0_i32, %c0_i32_0 : i32, i32
  }
  func.func @transform_3(%arg0: i32) -> (i32, i32) {
    %c0_i32 = arith.constant 0 : i32
    %c0_i32_0 = arith.constant 0 : i32
    %c0_i32_1 = arith.constant 0 : i32
    return %c0_i32, %c0_i32_0 : i32, i32
  }
  func.func @transform_4(%arg0: i32) -> (i32, i32, i32) {
    %c0_i32 = arith.constant 0 : i32
    %c0_i32_0 = arith.constant 0 : i32
    %c0_i32_1 = arith.constant 0 : i32
    return %arg0, %c0_i32, %c0_i32_0 : i32, i32, i32
  }
}

module attributes {stable_mosaic.version = 11 : i64} {
  func.func @_soft_clip_kernel(%arg0: i32, %arg1: memref<8x8xf32, #tpu.memory_space<vmem>>, %arg2: memref<8x8xf32, #tpu.memory_space<vmem>>, %arg3: memref<8x128xf32, #tpu.memory_space<vmem>>, %arg4: memref<8x128xf32, #tpu.memory_space<vmem>>, %arg5: memref<1x8x128xf32, #tpu.memory_space<vmem>>) attributes {dimension_semantics = [#tpu.dimension_semantics<parallel>], iteration_bounds = array<i64: 1>, scalar_prefetch = 0 : i64, scratch_operands = 0 : i64, tpu.core_type = #tpu.core_type<tc>, window_params = [{transform_indices = @transform_0, window_bounds = array<i64: 8, 8>}, {transform_indices = @transform_1, window_bounds = array<i64: 8, 8>}, {pipeline_mode = #tpu.pipeline_mode<synchronous>, transform_indices = @transform_2, window_bounds = array<i64: 8, 128>}, {pipeline_mode = #tpu.pipeline_mode<synchronous>, transform_indices = @transform_3, window_bounds = array<i64: 8, 128>}, {transform_indices = @transform_4, window_bounds = array<i64: 1, 8, 128>}]} {
    %c8_i32 = arith.constant 8 : i32
    %0 = arith.muli %arg0, %c8_i32 : i32
    %1 = tpu.assume_multiple %0, 8 : i32
    %2 = arith.index_cast %1 : i32 to index
    %c0 = arith.constant 0 : index
    %3 = vector.load %arg4[%2, %c0] : memref<8x128xf32, #tpu.memory_space<vmem>>, vector<8x128xf32>
    %c0_0 = arith.constant 0 : index
    %c0_1 = arith.constant 0 : index
    %4 = vector.load %arg3[%c0_0, %c0_1] : memref<8x128xf32, #tpu.memory_space<vmem>>, vector<8x128xf32>
    %cst = arith.constant dense<0.000000e+00> : vector<8x8xf32>
    %5 = tpu.matmul %3, %4, %cst {dimension_numbers = #tpu.dot_dimension_numbers<[1], [1], [0], [0], [0, 0, 1, 0], [], []>} : vector<8x128xf32>, vector<8x128xf32>, vector<8x8xf32> -> vector<8x8xf32>
    %c0_2 = arith.constant 0 : index
    %c0_3 = arith.constant 0 : index
    %6 = vector.load %arg1[%c0_2, %c0_3] : memref<8x8xf32, #tpu.memory_space<vmem>>, vector<8x8xf32>
    %cst_4 = arith.constant dense<0xFF800000> : vector<8xf32>
    %7 = vector.multi_reduction <maximumf>, %6, %cst_4 [1] : vector<8x8xf32> to vector<8xf32>
    %8 = vector.shape_cast %7 : vector<8xf32> to vector<8x1xf32>
    %9 = vector.broadcast %8 : vector<8x1xf32> to vector<8x8xf32>
    %10 = arith.subf %6, %9 : vector<8x8xf32>
    %11 = math.exp %10 : vector<8x8xf32>
    %cst_5 = arith.constant dense<0.000000e+00> : vector<8xf32>
    %12 = vector.multi_reduction <add>, %11, %cst_5 [1] : vector<8x8xf32> to vector<8xf32>
    %13 = vector.shape_cast %12 : vector<8xf32> to vector<8x1xf32>
    %14 = math.log %13 : vector<8x1xf32>
    %cst_6 = arith.constant dense<0xFF800000> : vector<8xf32>
    %15 = vector.multi_reduction <maximumf>, %5, %cst_6 [1] : vector<8x8xf32> to vector<8xf32>
    %16 = vector.shape_cast %15 : vector<8xf32> to vector<8x1xf32>
    %17 = vector.broadcast %16 : vector<8x1xf32> to vector<8x8xf32>
    %18 = arith.subf %5, %17 : vector<8x8xf32>
    %19 = math.exp %18 : vector<8x8xf32>
    %cst_7 = arith.constant dense<0.000000e+00> : vector<8xf32>
    %20 = vector.multi_reduction <add>, %19, %cst_7 [1] : vector<8x8xf32> to vector<8xf32>
    %21 = vector.shape_cast %20 : vector<8xf32> to vector<8x1xf32>
    %22 = arith.mulf %19, %10 : vector<8x8xf32>
    %cst_8 = arith.constant dense<0.000000e+00> : vector<8xf32>
    %23 = vector.multi_reduction <add>, %22, %cst_8 [1] : vector<8x8xf32> to vector<8xf32>
    %24 = vector.shape_cast %23 : vector<8xf32> to vector<8x1xf32>
    %25 = vector.shape_cast %14 : vector<8x1xf32> to vector<1x8x1xf32>
    %cst_9 = arith.constant dense<0.000000e+00> : vector<1xf32>
    %26 = vector.multi_reduction <add>, %25, %cst_9 [1, 2] : vector<1x8x1xf32> to vector<1xf32>
    %27 = vector.shape_cast %26 : vector<1xf32> to vector<1x1x1xf32>
    %28 = vector.extract %27[0, 0, 0] : f32 from vector<1x1x1xf32>
    %29 = tpu.reciprocal %21 {approx = true} : vector<8x1xf32> -> vector<8x1xf32>
    %30 = arith.mulf %24, %29 : vector<8x1xf32>
    %31 = vector.shape_cast %30 : vector<8x1xf32> to vector<1x8x1xf32>
    %cst_10 = arith.constant dense<0.000000e+00> : vector<1xf32>
    %32 = vector.multi_reduction <add>, %31, %cst_10 [1, 2] : vector<1x8x1xf32> to vector<1xf32>
    %33 = vector.shape_cast %32 : vector<1xf32> to vector<1x1x1xf32>
    %34 = vector.extract %33[0, 0, 0] : f32 from vector<1x1x1xf32>
    %35 = arith.subf %28, %34 : f32
    %36 = arith.index_cast %1 : i32 to index
    %c0_11 = arith.constant 0 : index
    %37 = vector.load %arg3[%36, %c0_11] : memref<8x128xf32, #tpu.memory_space<vmem>>, vector<8x128xf32>
    %c0_12 = arith.constant 0 : index
    %c0_13 = arith.constant 0 : index
    %38 = vector.load %arg4[%c0_12, %c0_13] : memref<8x128xf32, #tpu.memory_space<vmem>>, vector<8x128xf32>
    %cst_14 = arith.constant dense<0.000000e+00> : vector<8x8xf32>
    %39 = tpu.matmul %38, %37, %cst_14 {dimension_numbers = #tpu.dot_dimension_numbers<[1], [1], [0], [0], [0, 0, 1, 0], [], []>} : vector<8x128xf32>, vector<8x128xf32>, vector<8x8xf32> -> vector<8x8xf32>
    %c0_15 = arith.constant 0 : index
    %c0_16 = arith.constant 0 : index
    %40 = vector.load %arg2[%c0_15, %c0_16] : memref<8x8xf32, #tpu.memory_space<vmem>>, vector<8x8xf32>
    %cst_17 = arith.constant dense<0xFF800000> : vector<8xf32>
    %41 = vector.multi_reduction <maximumf>, %40, %cst_17 [0] : vector<8x8xf32> to vector<8xf32>
    %42 = vector.shape_cast %41 : vector<8xf32> to vector<1x8xf32>
    %43 = vector.broadcast %42 : vector<1x8xf32> to vector<8x8xf32>
    %44 = arith.subf %40, %43 : vector<8x8xf32>
    %45 = math.exp %44 : vector<8x8xf32>
    %cst_18 = arith.constant dense<0.000000e+00> : vector<8xf32>
    %46 = vector.multi_reduction <add>, %45, %cst_18 [0] : vector<8x8xf32> to vector<8xf32>
    %47 = vector.shape_cast %46 : vector<8xf32> to vector<1x8xf32>
    %48 = math.log %47 : vector<1x8xf32>
    %cst_19 = arith.constant dense<0xFF800000> : vector<8xf32>
    %49 = vector.multi_reduction <maximumf>, %39, %cst_19 [0] : vector<8x8xf32> to vector<8xf32>
    %50 = vector.shape_cast %49 : vector<8xf32> to vector<1x8xf32>
    %51 = vector.broadcast %50 : vector<1x8xf32> to vector<8x8xf32>
    %52 = arith.subf %39, %51 : vector<8x8xf32>
    %53 = math.exp %52 : vector<8x8xf32>
    %cst_20 = arith.constant dense<0.000000e+00> : vector<8xf32>
    %54 = vector.multi_reduction <add>, %53, %cst_20 [0] : vector<8x8xf32> to vector<8xf32>
    %55 = vector.shape_cast %54 : vector<8xf32> to vector<1x8xf32>
    %56 = arith.mulf %53, %44 : vector<8x8xf32>
    %cst_21 = arith.constant dense<0.000000e+00> : vector<8xf32>
    %57 = vector.multi_reduction <add>, %56, %cst_21 [0] : vector<8x8xf32> to vector<8xf32>
    %58 = vector.shape_cast %57 : vector<8xf32> to vector<1x8xf32>
    %59 = vector.shape_cast %48 : vector<1x8xf32> to vector<1x1x8xf32>
    %cst_22 = arith.constant dense<0.000000e+00> : vector<1xf32>
    %60 = vector.multi_reduction <add>, %59, %cst_22 [1, 2] : vector<1x1x8xf32> to vector<1xf32>
    %61 = vector.shape_cast %60 : vector<1xf32> to vector<1x1x1xf32>
    %62 = vector.extract %61[0, 0, 0] : f32 from vector<1x1x1xf32>
    %63 = tpu.reciprocal %55 {approx = true} : vector<1x8xf32> -> vector<1x8xf32>
    %64 = arith.mulf %58, %63 : vector<1x8xf32>
    %65 = vector.shape_cast %64 : vector<1x8xf32> to vector<1x1x8xf32>
    %cst_23 = arith.constant dense<0.000000e+00> : vector<1xf32>
    %66 = vector.multi_reduction <add>, %65, %cst_23 [1, 2] : vector<1x1x8xf32> to vector<1xf32>
    %67 = vector.shape_cast %66 : vector<1xf32> to vector<1x1x1xf32>
    %68 = vector.extract %67[0, 0, 0] : f32 from vector<1x1x1xf32>
    %69 = arith.subf %62, %68 : f32
    %70 = arith.addf %35, %69 : f32
    %cst_24 = arith.constant 6.250000e-02 : f32
    %71 = arith.mulf %70, %cst_24 : f32
    %72 = vector.broadcast %71 : f32 to vector<1x8x128xf32>
    %c0_25 = arith.constant 0 : index
    %c0_26 = arith.constant 0 : index
    %c0_27 = arith.constant 0 : index
    %73 = vector.load %arg5[%c0_25, %c0_26, %c0_27] : memref<1x8x128xf32, #tpu.memory_space<vmem>>, vector<1x8x128xf32>
    tpu.vector_store %arg5[%c0_25, %c0_26, %c0_27], %72 {strides = array<i32>} : memref<1x8x128xf32, #tpu.memory_space<vmem>>, vector<1x8x128xf32>,
    return
  }
  func.func @transform_0(%arg0: i32) -> (i32, i32) {
    %c0_i32 = arith.constant 0 : i32
    %c0_i32_0 = arith.constant 0 : i32
    return %arg0, %c0_i32 : i32, i32
  }
  func.func @transform_1(%arg0: i32) -> (i32, i32) {
    %c0_i32 = arith.constant 0 : i32
    %c0_i32_0 = arith.constant 0 : i32
    return %c0_i32, %arg0 : i32, i32
  }
  func.func @transform_2(%arg0: i32) -> (i32, i32) {
    %c0_i32 = arith.constant 0 : i32
    %c0_i32_0 = arith.constant 0 : i32
    %c0_i32_1 = arith.constant 0 : i32
    return %c0_i32, %c0_i32_0 : i32, i32
  }
  func.func @transform_3(%arg0: i32) -> (i32, i32) {
    %c0_i32 = arith.constant 0 : i32
    %c0_i32_0 = arith.constant 0 : i32
    %c0_i32_1 = arith.constant 0 : i32
    return %c0_i32, %c0_i32_0 : i32, i32
  }
  func.func @transform_4(%arg0: i32) -> (i32, i32, i32) {
    %c0_i32 = arith.constant 0 : i32
    %c0_i32_0 = arith.constant 0 : i32
    %c0_i32_1 = arith.constant 0 : i32
    return %arg0, %c0_i32, %c0_i32_0 : i32, i32, i32
  }
}

</mosaic_0001>

<bundles_post_ra>
// kernel: tpu_custom_call.1
= control target key start
LH: loop header
LB: loop body
LE: loop exit
PB: predicated region body
PF: predicated region fallthrough
CT: control target
= control target key end

     0   :  { %9 = vsyncpa [#allocation3], 0  ;;  %s568_s0 = inlined_call_operand.hbm [shape: f32[8,8], index: 0, kind: input, shape index: {}]   ;;  %s569_s1 = inlined_call_operand.hbm [shape: f32[8,8], index: 1, kind: input, shape index: {}]   ;;  %s570_s2 = inlined_call_operand.hbm [shape: f32[8,128], index: 2, kind: input, shape index: {}]   ;;  %s571_s3 = inlined_call_operand.hbm [shape: f32[8,128], index: 3, kind: input, shape index: {}]   ;;  %s572_s4 = inlined_call_operand.hbm [shape: f32[1,8,128], index: 4, kind: output, shape index: {}]  }
   0x1   :  { %10 = vsyncpa [#allocation6], 0 }
   0x2   :  { %11 = vsyncpa [#allocation9], 0 }
   0x3   :  { %12 = vsyncpa [#allocation4], 0  ;;  %s505_s15 = smov [#allocation5]   ;;  %s506_s17 = smov [#allocation2]  }
   0x4   :  { %s29_s16 = sshll.u32 %s505_s15, 4  ;;  %s19_s18 = sshll.u32 %s506_s17, 4  ;;  %s30_s16 = int_to_ptr.vmem [resolvable:$true] %s29_s16  ;;  %s20_s18 = int_to_ptr.vmem [resolvable:$true] %s19_s18 }
   0x5   :  { %s405_s19 = scalar_lea.vmem %s30_s16, 128  ;;  %p410_p1 = scmp.lt.s32.totalorder %s30_s16, %s30_s16 }
   0x6   :  { %p406_p0 = scmp.ne.s32.totalorder %s30_s16, %s405_s19  ;;  %p411_p2 = scmp.lt.s32.totalorder %s405_s19, %s405_s19 }
   0x8   :  { %p412_p3 = por %p411_p2, %p410_p1 }
   0xa   :  { %p413_p4 = pnand %p412_p3, %p406_p0 }
   0xc   :  { %416 = shalt.err (!%p413_p4)
}
   0xd   :  { %32 = dma.hbm_to_vmem [thread:$0]  %s569_s1, 128, %s30_s16, [#allocation6]  }
   0xe   :  { %s425_s22 = scalar_lea.vmem %s20_s18, 128  ;;  %p430_p6 = scmp.lt.s32.totalorder %s20_s18, %s20_s18 }
   0xf   :  { %p426_p5 = scmp.ne.s32.totalorder %s20_s18, %s425_s22  ;;  %p431_p7 = scmp.lt.s32.totalorder %s425_s22, %s425_s22 }
  0x11   :  { %p432_p8 = por %p431_p7, %p430_p6 }
  0x13   :  { %p433_p9 = pnand %p432_p8, %p426_p5 }
  0x15   :  { %436 = shalt.err (!%p433_p9)
}
  0x16   :  { %22 = dma.hbm_to_vmem [thread:$0]  %s568_s0, 128, %s20_s18, [#allocation3]  }
  0x17   :  { %s507_s25 = smov [#allocation7]   ;;  %s508_s27 = smov [#allocation8]  }
  0x18   :  { %s39_s26 = sshll.u32 %s507_s25, 4  ;;  %s49_s28 = sshll.u32 %s508_s27, 4  ;;  %s40_s26 = int_to_ptr.vmem [resolvable:$true] %s39_s26  ;;  %s50_s28 = int_to_ptr.vmem [resolvable:$true] %s49_s28 }
  0x19   :  { %s445_s29 = scalar_lea.vmem %s40_s26, 128  ;;  %p450_p11 = scmp.lt.s32.totalorder %s40_s26, %s40_s26 }
  0x1a   :  { %p446_p10 = scmp.ne.s32.totalorder %s40_s26, %s445_s29  ;;  %p451_p12 = scmp.lt.s32.totalorder %s445_s29, %s445_s29 }
  0x1c   :  { %p452_p13 = por %p451_p12, %p450_p11 }
  0x1e   :  { %p453_p0 = pnand %p452_p13, %p446_p10 }
  0x20   :  { %456 = shalt.err (!%p453_p0)
}
  0x21   :  { %42 = dma.hbm_to_vmem [thread:$0]  %s570_s2, 128, %s40_s26, [#allocation6]  }
  0x22   :  { %s465_s5 = scalar_lea.vmem %s50_s28, 128  ;;  %p470_p2 = scmp.lt.s32.totalorder %s50_s28, %s50_s28 }
  0x23   :  { %p466_p1 = scmp.ne.s32.totalorder %s50_s28, %s465_s5  ;;  %p471_p3 = scmp.lt.s32.totalorder %s465_s5, %s465_s5 }
  0x25   :  { %p472_p4 = por %p471_p3, %p470_p2 }
  0x27   :  { %p473_p5 = pnand %p472_p4, %p466_p1 }
  0x29   :  { %476 = shalt.err (!%p473_p5)
}
  0x2a   :  { %52 = dma.hbm_to_vmem [thread:$0]  %s571_s3, 128, %s50_s28, [#allocation9]  }
  0x2b   :  { %497 = dma.done.wait [#allocation3], 128  }
  0x2c   :  { %498 = vsyncadd [#allocation3], 4294967168 }
  0x2d   :  { %499 = dma.done.wait [#allocation6], 256  }
  0x2e   :  { %500 = vsyncadd [#allocation6], 4294967040 }
  0x2f   :  { %501 = dma.done.wait [#allocation9], 128  }
  0x30   :  { %502 = vsyncadd [#allocation9], 4294967168  ;;  %v509_v0 = vmov 0.0   ;;  %vm510_vm0 = vmmov 0   ;;  %vm140_vm1 = vcmask 64512   ;;  %v68_v1 = vld [vmem:[#allocation7] sm:$0xff] }
  0x31   :  { %356 = vmatprep.subr.mxu0 %v509_v0  ;;  %358 = vmatprep.mubr.msk.f32.mxu0 %vm510_vm0, %v509_v0  ;;  %v139_v2 = vld [vmem:[#allocation2] sm:$0xff]  ;;  %v67_v3 = vld [vmem:[#allocation8] sm:$0xff]  ;;  %v262_v26 = vld [vmem:[#allocation5] sm:$0xff]  ;;  %vm307_vm2 = vcmask 57344   ;;  %vm165_vm3 = vcmask 7168   ;;  %s511_s12 = smov [#allocation10]  }
  0x32   :  { %361 = vmatprep.subr.mxu1 %v509_v0  ;;  %363 = vmatprep.mubr.msk.f32.mxu1 %vm510_vm0, %v509_v0  ;;  %v141_v4 = vsel %vm140_vm1, %v139_v2, -inf  ;;  %v263_v27 = vsel %vm140_vm1, %v262_v26, -inf  ;;  %s341_s13 = sshll.u32 %s511_s12, 4  ;;  %s342_s13 = int_to_ptr.vmem [resolvable:$true] %s341_s13 }
  0x33   :  { %357 = vmatpush3.xpose.msra.mxu0 %v68_v1  ;;  %362 = vmatpush3.xpose.msra.mxu1 %v68_v1  ;;  %v264_v29 = vrot.slane %v263_v27, 4  ;;  %s477_s15 = scalar_lea.vmem %s342_s13, 128  ;;  %p482_p7 = scmp.lt.s32.totalorder %s342_s13, %s342_s13 }
  0x34   :  { %142 = vmax.xlane.f32.xlu0 %v141_v4  ;;  %p478_p6 = scmp.ne.s32.totalorder %s342_s13, %s477_s15  ;;  %p483_p8 = scmp.lt.s32.totalorder %s477_s15, %s477_s15 }
  0x35   :  { %v265_v30 = vmax.f32 %v263_v27, %v264_v29 }
  0x36   :  { %359 = vmatmul.mubr.f32.vlgmr.msra.gmra.mxu0 %v67_v3  ;;  %364 = vmatmul.mubr.f32.vlgmr.msra.gmra.mxu1 %v67_v3  ;;  %p484_p9 = por %p483_p8, %p482_p7 }
  0x37   :  { %v266_v32 = vrot.slane %v265_v30, 2 }
  0x38   :  { %p485_p10 = pnand %p484_p9, %p478_p6 }
  0x39   :  { %v267_v33 = vmax.f32 %v265_v30, %v266_v32 }
  0x3b   :  { %v268_v35 = vrot.slane %v267_v33, 1 }
  0x3d   :  { %v269_v36 = vmax.f32 %v267_v33, %v268_v35 }
  0x3f   :  { %v270_v37 = vsub.f32 %v262_v26, %v269_v36 }
  0x41   :  { %v271_v39 = vmul.f32 1.442695, %v270_v37 }
  0xbd   :  { %v143_v5 = vpop.xlane.xlu0 %142 }
  0xbe   :  { %v550_v6 = vsub.f32 %v139_v2, %v143_v5 }
  0xc0   :  { %v145_v7 = vmul.f32 1.442695, %v550_v6 }
  0xc2   :  { %381 = vpow2.f32 %v145_v7 }
  0xcf   :  { %v382_v11 = vpop.eup %381 }
  0xd0   :  { %v147_v12 = vsel %vm140_vm1, %v382_v11, 0.0 }
  0xd1   :  { %148 = vadd.xlane.f32.xlu1 %v147_v12 }
  0xf6   :  { %v135_v8 = vpop.f32.mrf.mxu0  ;;  %v258_v13 = vpop.f32.mrf.mxu1 }
  0xf7   :  { %v152_v9 = vsel %vm140_vm1, %v135_v8, -inf  ;;  %v282_v15 = vsel %vm140_vm1, %v258_v13, -inf }
  0xf8   :  { %153 = vmax.xlane.f32.xlu0 %v152_v9  ;;  %v360_v10 = vpop.f32.mrf.mxu0  ;;  %v365_v14 = vpop.f32.mrf.mxu1  ;;  %v283_v16 = vrot.slane %v282_v15, 4 }
  0xfa   :  { %v284_v17 = vmax.f32 %v282_v15, %v283_v16 }
  0xfc   :  { %v285_v18 = vrot.slane %v284_v17, 2 }
  0xfe   :  { %v286_v19 = vmax.f32 %v284_v17, %v285_v18 }
 0x100   :  { %v287_v20 = vrot.slane %v286_v19, 1 }
 0x102   :  { %v288_v21 = vmax.f32 %v286_v19, %v287_v20 }
 0x104   :  { %v289_v22 = vsub.f32 %v258_v13, %v288_v21 }
 0x106   :  { %v290_v23 = vmul.f32 1.442695, %v289_v22 }
 0x108   :  { %383 = vpow2.f32 %v290_v23 }
 0x109   :  { %385 = vpow2.f32 %v271_v39 }
 0x115   :  { %v384_v24 = vpop.eup %383 }
 0x116   :  { %v292_v25 = vsel %vm140_vm1, %v384_v24, 0.0  ;;  %v299_v44 = vmul.f32 %v384_v24, %v270_v37  ;;  %v386_v52 = vpop.eup %385 }
 0x117   :  { %v293_v28 = vrot.slane %v292_v25, 4  ;;  %v273_v54 = vsel %vm140_vm1, %v386_v52, 0.0 }
 0x118   :  { %v300_v46 = vsel %vm140_vm1, %v299_v44, 0.0  ;;  %v274_v57 = vrot.slane %v273_v54, 4 }
 0x119   :  { %v294_v31 = vadd.f32 %v293_v28, %v292_v25  ;;  %v301_v47 = vrot.slane %v300_v46, 4 }
 0x11a   :  { %v275_v60 = vadd.f32 %v274_v57, %v273_v54 }
 0x11b   :  { %v295_v34 = vrot.slane %v294_v31, 2  ;;  %v302_v48 = vadd.f32 %v301_v47, %v300_v46 }
 0x11c   :  { %v276_v0 = vrot.slane %v275_v60, 2 }
 0x11d   :  { %v296_v38 = vadd.f32 %v295_v34, %v294_v31  ;;  %v303_v49 = vrot.slane %v302_v48, 2 }
 0x11e   :  { %v277_v2 = vadd.f32 %v276_v0, %v275_v60 }
 0x11f   :  { %v297_v40 = vrot.slane %v296_v38, 1  ;;  %v304_v50 = vadd.f32 %v303_v49, %v302_v48 }
 0x120   :  { %v278_v3 = vrot.slane %v277_v2, 1 }
 0x121   :  { %v298_v43 = vadd.f32 %v297_v40, %v296_v38  ;;  %v305_v51 = vrot.slane %v304_v50, 1 }
 0x122   :  { %v279_v4 = vadd.f32 %v278_v3, %v277_v2 }
 0x123   :  { %387 = vrcp.f32 %v298_v43  ;;  %v306_v55 = vadd.f32 %v305_v51, %v304_v50 }
 0x130   :  { %v388_v56 = vpop.eup %387 }
 0x131   :  { %v319_v58 = vmul.f32 %v388_v56, %v306_v55 }
 0x133   :  { %v320_v63 = vsel %vm307_vm2, %v319_v58, 0.0 }
 0x15a   :  { %v149_v53 = vpop.xlane.xlu1 %148 }
 0x181   :  { %v154_v41 = vpop.xlane.xlu0 %153 }
 0x182   :  { %v155_v42 = vsub.f32 %v135_v8, %v154_v41 }
 0x184   :  { %v156_v45 = vmul.f32 1.442695, %v155_v42 }
 0x186   :  { %389 = vpow2.f32 %v156_v45 }
 0x187   :  { %391 = vlog2.f32 %v149_v53 }
 0x188   :  { %393 = vlog2.f32 %v279_v4 }
 0x193   :  { %v390_v59 = vpop.eup %389 }
 0x194   :  { %v158_v61 = vsel %vm140_vm1, %v390_v59, 0.0  ;;  %v161_v62 = vmul.f32 %v390_v59, %v550_v6  ;;  %v392_v5 = vpop.eup %391 }
 0x195   :  { %159 = vadd.xlane.f32.xlu1 %v158_v61  ;;  %v151_v7 = vmul.f32 0.6931472, %v392_v5  ;;  %v394_v9 = vpop.eup %393 }
 0x196   :  { %v162_v1 = vsel %vm140_vm1, %v161_v62, 0.0  ;;  %v281_v10 = vmul.f32 0.6931472, %v394_v9 }
 0x197   :  { %163 = vadd.xlane.f32.xlu0 %v162_v1  ;;  %v166_v8 = vsel %vm165_vm3, %v151_v7, 0.0 }
 0x198   :  { %v308_v6 = vsel %vm307_vm2, %v281_v10, 0.0 }
 0x199   :  { %167 = vadd.xlane.f32.xlu1 %v166_v8 }
 0x19d   :  { %309 = vadd.xlane.f32.xlu1 %v308_v6 }
 0x21e   :  { %v160_v11 = vpop.xlane.xlu1 %159 }
 0x21f   :  { %395 = vrcp.f32 %v160_v11 }
 0x220   :  { %v164_v13 = vpop.xlane.xlu0 %163 }
 0x222   :  { %v168_v16 = vpop.xlane.xlu1 %167 }
 0x223   :  { %v169_v17 = vrot.slane %v168_v16, 4 }
 0x225   :  { %v170_v18 = vadd.f32 %v169_v17, %v168_v16 }
 0x226   :  { %v310_v23 = vpop.xlane.xlu1 %309 }
 0x227   :  { %v171_v19 = vrot.slane %v170_v18, 2  ;;  %v311_v24 = vrot.slane %v310_v23, 4 }
 0x229   :  { %v172_v20 = vadd.f32 %v171_v19, %v170_v18  ;;  %v312_v25 = vadd.f32 %v311_v24, %v310_v23 }
 0x22b   :  { %v173_v21 = vrot.slane %v172_v20, 1  ;;  %v313_v26 = vrot.slane %v312_v25, 2 }
 0x22c   :  { %v396_v12 = vpop.eup %395 }
 0x22d   :  { %v177_v14 = vmul.f32 %v396_v12, %v164_v13  ;;  %v174_v22 = vadd.f32 %v173_v21, %v172_v20  ;;  %v314_v30 = vadd.f32 %v313_v26, %v312_v25 }
 0x22f   :  { %v178_v15 = vsel %vm165_vm3, %v177_v14, 0.0  ;;  %366 = vpush %v174_v22  ;;  %v315_v36 = vrot.slane %v314_v30, 1 }
 0x230   :  { %179 = vadd.xlane.f32.xlu0 %v178_v15 }
 0x231   :  { %v316_v41 = vadd.f32 %v315_v36, %v314_v30 }
 0x234   :  { %321 = vadd.xlane.f32.xlu0 %v320_v63 }
 0x260   :  { %s367_s2 = spop %366 }
 0x2b9   :  { %v180_v27 = vpop.xlane.xlu0 %179 }
 0x2ba   :  { %v181_v28 = vrot.slane %v180_v27, 4 }
 0x2bc   :  { %v182_v29 = vadd.f32 %v181_v28, %v180_v27 }
 0x2bd   :  { %v322_v31 = vpop.xlane.xlu0 %321 }
 0x2be   :  { %v183_v32 = vrot.slane %v182_v29, 2  ;;  %v323_v33 = vrot.slane %v322_v31, 4 }
 0x2c0   :  { %v324_v34 = vadd.f32 %v323_v33, %v322_v31  ;;  %v184_v35 = vadd.f32 %v183_v32, %v182_v29 }
 0x2c2   :  { %v325_v37 = vrot.slane %v324_v34, 2  ;;  %v185_v38 = vrot.slane %v184_v35, 1 }
 0x2c4   :  { %v326_v39 = vadd.f32 %v325_v37, %v324_v34  ;;  %v186_v40 = vadd.f32 %v185_v38, %v184_v35 }
 0x2c6   :  { %368 = vpush %v186_v40  ;;  %v327_v42 = vrot.slane %v326_v39, 1 }
 0x2c7   :  { %370 = vpush %v316_v41 }
 0x2c8   :  { %v328_v43 = vadd.f32 %v327_v42, %v326_v39 }
 0x2ca   :  { %372 = vpush %v328_v43 }
 0x2f7   :  { %s369_s3 = spop %368 }
 0x2f8   :  { %s371_s7 = spop %370  ;;  %s188_s8 = ssub.f32 %s367_s2, %s369_s3 }
 0x2fb   :  { %s373_s9 = spop %372 }
 0x2fc   :  { %s330_s10 = ssub.f32 %s371_s7, %s373_s9 }
 0x2fe   :  { %s331_s11 = sadd.f32 %s330_s10, %s188_s8 }
 0x300   :  { %s332_s14 = smul.f32 0.0625, %s331_s11 }
 0x302   :  { %v333_v44 = vstv %s332_s14 }
 0x303   :  { %334 = vst [vmem:[#allocation10] sm:$0xff] %v333_v44 }
 0x304   :  { %488 = shalt.err (!%p485_p10)
}
 0x305   :  { %344 = dma.vmem_to_hbm [thread:$0]  %s342_s13, 128, %s572_s4, [#allocation4]  }
 0x306   :  { %503 = dma.done.wait [#allocation4], 128  }
 0x307   :  { %504 = vsyncadd [#allocation4], 4294967168 }
 0x308   :  { %348 = vsyncpa [#allocation3], 1 }
 0x309   :  { %349 = vsyncpa [#allocation6], 1 }
 0x30a   :  { %350 = vsyncpa [#allocation9], 1 }
 0x30b   :  { %351 = vsyncpa [#allocation4], 1 }

// kernel: tpu_custom_call.1
= control target key start
LH: loop header
LB: loop body
LE: loop exit
PB: predicated region body
PF: predicated region fallthrough
CT: control target
= control target key end

     0   :  { %9 = vsyncpa [#allocation3], 0  ;;  %s568_s0 = inlined_call_operand.hbm [shape: f32[8,8], index: 0, kind: input, shape index: {}]   ;;  %s569_s1 = inlined_call_operand.hbm [shape: f32[8,8], index: 1, kind: input, shape index: {}]   ;;  %s570_s2 = inlined_call_operand.hbm [shape: f32[8,128], index: 2, kind: input, shape index: {}]   ;;  %s571_s3 = inlined_call_operand.hbm [shape: f32[8,128], index: 3, kind: input, shape index: {}]   ;;  %s572_s4 = inlined_call_operand.hbm [shape: f32[1,8,128], index: 4, kind: output, shape index: {}]  }
   0x1   :  { %10 = vsyncpa [#allocation6], 0 }
   0x2   :  { %11 = vsyncpa [#allocation9], 0 }
   0x3   :  { %12 = vsyncpa [#allocation4], 0  ;;  %s505_s15 = smov [#allocation5]   ;;  %s506_s17 = smov [#allocation2]  }
   0x4   :  { %s29_s16 = sshll.u32 %s505_s15, 4  ;;  %s19_s18 = sshll.u32 %s506_s17, 4  ;;  %s30_s16 = int_to_ptr.vmem [resolvable:$true] %s29_s16  ;;  %s20_s18 = int_to_ptr.vmem [resolvable:$true] %s19_s18 }
   0x5   :  { %s405_s19 = scalar_lea.vmem %s30_s16, 128  ;;  %p410_p1 = scmp.lt.s32.totalorder %s30_s16, %s30_s16 }
   0x6   :  { %p406_p0 = scmp.ne.s32.totalorder %s30_s16, %s405_s19  ;;  %p411_p2 = scmp.lt.s32.totalorder %s405_s19, %s405_s19 }
   0x8   :  { %p412_p3 = por %p411_p2, %p410_p1 }
   0xa   :  { %p413_p4 = pnand %p412_p3, %p406_p0 }
   0xc   :  { %416 = shalt.err (!%p413_p4)
}
   0xd   :  { %32 = dma.hbm_to_vmem [thread:$0]  %s569_s1, 128, %s30_s16, [#allocation6]  }
   0xe   :  { %s425_s22 = scalar_lea.vmem %s20_s18, 128  ;;  %p430_p6 = scmp.lt.s32.totalorder %s20_s18, %s20_s18 }
   0xf   :  { %p426_p5 = scmp.ne.s32.totalorder %s20_s18, %s425_s22  ;;  %p431_p7 = scmp.lt.s32.totalorder %s425_s22, %s425_s22 }
  0x11   :  { %p432_p8 = por %p431_p7, %p430_p6 }
  0x13   :  { %p433_p9 = pnand %p432_p8, %p426_p5 }
  0x15   :  { %436 = shalt.err (!%p433_p9)
}
  0x16   :  { %22 = dma.hbm_to_vmem [thread:$0]  %s568_s0, 128, %s20_s18, [#allocation3]  }
  0x17   :  { %s507_s25 = smov [#allocation7]   ;;  %s508_s27 = smov [#allocation8]  }
  0x18   :  { %s39_s26 = sshll.u32 %s507_s25, 4  ;;  %s49_s28 = sshll.u32 %s508_s27, 4  ;;  %s40_s26 = int_to_ptr.vmem [resolvable:$true] %s39_s26  ;;  %s50_s28 = int_to_ptr.vmem [resolvable:$true] %s49_s28 }
  0x19   :  { %s445_s29 = scalar_lea.vmem %s40_s26, 128  ;;  %p450_p11 = scmp.lt.s32.totalorder %s40_s26, %s40_s26 }
  0x1a   :  { %p446_p10 = scmp.ne.s32.totalorder %s40_s26, %s445_s29  ;;  %p451_p12 = scmp.lt.s32.totalorder %s445_s29, %s445_s29 }
  0x1c   :  { %p452_p13 = por %p451_p12, %p450_p11 }
  0x1e   :  { %p453_p0 = pnand %p452_p13, %p446_p10 }
  0x20   :  { %456 = shalt.err (!%p453_p0)
}
  0x21   :  { %42 = dma.hbm_to_vmem [thread:$0]  %s570_s2, 128, %s40_s26, [#allocation6]  }
  0x22   :  { %s465_s5 = scalar_lea.vmem %s50_s28, 128  ;;  %p470_p2 = scmp.lt.s32.totalorder %s50_s28, %s50_s28 }
  0x23   :  { %p466_p1 = scmp.ne.s32.totalorder %s50_s28, %s465_s5  ;;  %p471_p3 = scmp.lt.s32.totalorder %s465_s5, %s465_s5 }
  0x25   :  { %p472_p4 = por %p471_p3, %p470_p2 }
  0x27   :  { %p473_p5 = pnand %p472_p4, %p466_p1 }
  0x29   :  { %476 = shalt.err (!%p473_p5)
}
  0x2a   :  { %52 = dma.hbm_to_vmem [thread:$0]  %s571_s3, 128, %s50_s28, [#allocation9]  }
  0x2b   :  { %497 = dma.done.wait [#allocation3], 128  }
  0x2c   :  { %498 = vsyncadd [#allocation3], 4294967168 }
  0x2d   :  { %499 = dma.done.wait [#allocation6], 256  }
  0x2e   :  { %500 = vsyncadd [#allocation6], 4294967040 }
  0x2f   :  { %501 = dma.done.wait [#allocation9], 128  }
  0x30   :  { %502 = vsyncadd [#allocation9], 4294967168  ;;  %v509_v0 = vmov 0.0   ;;  %vm510_vm0 = vmmov 0   ;;  %vm140_vm1 = vcmask 64512   ;;  %v68_v1 = vld [vmem:[#allocation7] sm:$0xff] }
  0x31   :  { %356 = vmatprep.subr.mxu0 %v509_v0  ;;  %358 = vmatprep.mubr.msk.f32.mxu0 %vm510_vm0, %v509_v0  ;;  %v139_v2 = vld [vmem:[#allocation2] sm:$0xff]  ;;  %v67_v3 = vld [vmem:[#allocation8] sm:$0xff]  ;;  %v262_v26 = vld [vmem:[#allocation5] sm:$0xff]  ;;  %vm307_vm2 = vcmask 57344   ;;  %vm165_vm3 = vcmask 7168   ;;  %s511_s12 = smov [#allocation10]  }
  0x32   :  { %361 = vmatprep.subr.mxu1 %v509_v0  ;;  %363 = vmatprep.mubr.msk.f32.mxu1 %vm510_vm0, %v509_v0  ;;  %v141_v4 = vsel %vm140_vm1, %v139_v2, -inf  ;;  %v263_v27 = vsel %vm140_vm1, %v262_v26, -inf  ;;  %s341_s13 = sshll.u32 %s511_s12, 4  ;;  %s342_s13 = int_to_ptr.vmem [resolvable:$true] %s341_s13 }
  0x33   :  { %357 = vmatpush3.xpose.msra.mxu0 %v68_v1  ;;  %362 = vmatpush3.xpose.msra.mxu1 %v68_v1  ;;  %v264_v29 = vrot.slane %v263_v27, 4  ;;  %s477_s15 = scalar_lea.vmem %s342_s13, 128  ;;  %p482_p7 = scmp.lt.s32.totalorder %s342_s13, %s342_s13 }
  0x34   :  { %142 = vmax.xlane.f32.xlu0 %v141_v4  ;;  %p478_p6 = scmp.ne.s32.totalorder %s342_s13, %s477_s15  ;;  %p483_p8 = scmp.lt.s32.totalorder %s477_s15, %s477_s15 }
  0x35   :  { %v265_v30 = vmax.f32 %v263_v27, %v264_v29 }
  0x36   :  { %359 = vmatmul.mubr.f32.vlgmr.msra.gmra.mxu0 %v67_v3  ;;  %364 = vmatmul.mubr.f32.vlgmr.msra.gmra.mxu1 %v67_v3  ;;  %p484_p9 = por %p483_p8, %p482_p7 }
  0x37   :  { %v266_v32 = vrot.slane %v265_v30, 2 }
  0x38   :  { %p485_p10 = pnand %p484_p9, %p478_p6 }
  0x39   :  { %v267_v33 = vmax.f32 %v265_v30, %v266_v32 }
  0x3b   :  { %v268_v35 = vrot.slane %v267_v33, 1 }
  0x3d   :  { %v269_v36 = vmax.f32 %v267_v33, %v268_v35 }
  0x3f   :  { %v270_v37 = vsub.f32 %v262_v26, %v269_v36 }
  0x41   :  { %v271_v39 = vmul.f32 1.442695, %v270_v37 }
  0xbd   :  { %v143_v5 = vpop.xlane.xlu0 %142 }
  0xbe   :  { %v550_v6 = vsub.f32 %v139_v2, %v143_v5 }
  0xc0   :  { %v145_v7 = vmul.f32 1.442695, %v550_v6 }
  0xc2   :  { %381 = vpow2.f32 %v145_v7 }
  0xcf   :  { %v382_v11 = vpop.eup %381 }
  0xd0   :  { %v147_v12 = vsel %vm140_vm1, %v382_v11, 0.0 }
  0xd1   :  { %148 = vadd.xlane.f32.xlu1 %v147_v12 }
  0xf6   :  { %v135_v8 = vpop.f32.mrf.mxu0  ;;  %v258_v13 = vpop.f32.mrf.mxu1 }
  0xf7   :  { %v152_v9 = vsel %vm140_vm1, %v135_v8, -inf  ;;  %v282_v15 = vsel %vm140_vm1, %v258_v13, -inf }
  0xf8   :  { %153 = vmax.xlane.f32.xlu0 %v152_v9  ;;  %v360_v10 = vpop.f32.mrf.mxu0  ;;  %v365_v14 = vpop.f32.mrf.mxu1  ;;  %v283_v16 = vrot.slane %v282_v15, 4 }
  0xfa   :  { %v284_v17 = vmax.f32 %v282_v15, %v283_v16 }
  0xfc   :  { %v285_v18 = vrot.slane %v284_v17, 2 }
  0xfe   :  { %v286_v19 = vmax.f32 %v284_v17, %v285_v18 }
 0x100   :  { %v287_v20 = vrot.slane %v286_v19, 1 }
 0x102   :  { %v288_v21 = vmax.f32 %v286_v19, %v287_v20 }
 0x104   :  { %v289_v22 = vsub.f32 %v258_v13, %v288_v21 }
 0x106   :  { %v290_v23 = vmul.f32 1.442695, %v289_v22 }
 0x108   :  { %383 = vpow2.f32 %v290_v23 }
 0x109   :  { %385 = vpow2.f32 %v271_v39 }
 0x115   :  { %v384_v24 = vpop.eup %383 }
 0x116   :  { %v292_v25 = vsel %vm140_vm1, %v384_v24, 0.0  ;;  %v299_v44 = vmul.f32 %v384_v24, %v270_v37  ;;  %v386_v52 = vpop.eup %385 }
 0x117   :  { %v293_v28 = vrot.slane %v292_v25, 4  ;;  %v273_v54 = vsel %vm140_vm1, %v386_v52, 0.0 }
 0x118   :  { %v300_v46 = vsel %vm140_vm1, %v299_v44, 0.0  ;;  %v274_v57 = vrot.slane %v273_v54, 4 }
 0x119   :  { %v294_v31 = vadd.f32 %v293_v28, %v292_v25  ;;  %v301_v47 = vrot.slane %v300_v46, 4 }
 0x11a   :  { %v275_v60 = vadd.f32 %v274_v57, %v273_v54 }
 0x11b   :  { %v295_v34 = vrot.slane %v294_v31, 2  ;;  %v302_v48 = vadd.f32 %v301_v47, %v300_v46 }
 0x11c   :  { %v276_v0 = vrot.slane %v275_v60, 2 }
 0x11d   :  { %v296_v38 = vadd.f32 %v295_v34, %v294_v31  ;;  %v303_v49 = vrot.slane %v302_v48, 2 }
 0x11e   :  { %v277_v2 = vadd.f32 %v276_v0, %v275_v60 }
 0x11f   :  { %v297_v40 = vrot.slane %v296_v38, 1  ;;  %v304_v50 = vadd.f32 %v303_v49, %v302_v48 }
 0x120   :  { %v278_v3 = vrot.slane %v277_v2, 1 }
 0x121   :  { %v298_v43 = vadd.f32 %v297_v40, %v296_v38  ;;  %v305_v51 = vrot.slane %v304_v50, 1 }
 0x122   :  { %v279_v4 = vadd.f32 %v278_v3, %v277_v2 }
 0x123   :  { %387 = vrcp.f32 %v298_v43  ;;  %v306_v55 = vadd.f32 %v305_v51, %v304_v50 }
 0x130   :  { %v388_v56 = vpop.eup %387 }
 0x131   :  { %v319_v58 = vmul.f32 %v388_v56, %v306_v55 }
 0x133   :  { %v320_v63 = vsel %vm307_vm2, %v319_v58, 0.0 }
 0x15a   :  { %v149_v53 = vpop.xlane.xlu1 %148 }
 0x181   :  { %v154_v41 = vpop.xlane.xlu0 %153 }
 0x182   :  { %v155_v42 = vsub.f32 %v135_v8, %v154_v41 }
 0x184   :  { %v156_v45 = vmul.f32 1.442695, %v155_v42 }
 0x186   :  { %389 = vpow2.f32 %v156_v45 }
 0x187   :  { %391 = vlog2.f32 %v149_v53 }
 0x188   :  { %393 = vlog2.f32 %v279_v4 }
 0x193   :  { %v390_v59 = vpop.eup %389 }
 0x194   :  { %v158_v61 = vsel %vm140_vm1, %v390_v59, 0.0  ;;  %v161_v62 = vmul.f32 %v390_v59, %v550_v6  ;;  %v392_v5 = vpop.eup %391 }
 0x195   :  { %159 = vadd.xlane.f32.xlu1 %v158_v61  ;;  %v151_v7 = vmul.f32 0.6931472, %v392_v5  ;;  %v394_v9 = vpop.eup %393 }
 0x196   :  { %v162_v1 = vsel %vm140_vm1, %v161_v62, 0.0  ;;  %v281_v10 = vmul.f32 0.6931472, %v394_v9 }
 0x197   :  { %163 = vadd.xlane.f32.xlu0 %v162_v1  ;;  %v166_v8 = vsel %vm165_vm3, %v151_v7, 0.0 }
 0x198   :  { %v308_v6 = vsel %vm307_vm2, %v281_v10, 0.0 }
 0x199   :  { %167 = vadd.xlane.f32.xlu1 %v166_v8 }
 0x19d   :  { %309 = vadd.xlane.f32.xlu1 %v308_v6 }
 0x21e   :  { %v160_v11 = vpop.xlane.xlu1 %159 }
 0x21f   :  { %395 = vrcp.f32 %v160_v11 }
 0x220   :  { %v164_v13 = vpop.xlane.xlu0 %163 }
 0x222   :  { %v168_v16 = vpop.xlane.xlu1 %167 }
 0x223   :  { %v169_v17 = vrot.slane %v168_v16, 4 }
 0x225   :  { %v170_v18 = vadd.f32 %v169_v17, %v168_v16 }
 0x226   :  { %v310_v23 = vpop.xlane.xlu1 %309 }
 0x227   :  { %v171_v19 = vrot.slane %v170_v18, 2  ;;  %v311_v24 = vrot.slane %v310_v23, 4 }
 0x229   :  { %v172_v20 = vadd.f32 %v171_v19, %v170_v18  ;;  %v312_v25 = vadd.f32 %v311_v24, %v310_v23 }
 0x22b   :  { %v173_v21 = vrot.slane %v172_v20, 1  ;;  %v313_v26 = vrot.slane %v312_v25, 2 }
 0x22c   :  { %v396_v12 = vpop.eup %395 }
 0x22d   :  { %v177_v14 = vmul.f32 %v396_v12, %v164_v13  ;;  %v174_v22 = vadd.f32 %v173_v21, %v172_v20  ;;  %v314_v30 = vadd.f32 %v313_v26, %v312_v25 }
 0x22f   :  { %v178_v15 = vsel %vm165_vm3, %v177_v14, 0.0  ;;  %366 = vpush %v174_v22  ;;  %v315_v36 = vrot.slane %v314_v30, 1 }
 0x230   :  { %179 = vadd.xlane.f32.xlu0 %v178_v15 }
 0x231   :  { %v316_v41 = vadd.f32 %v315_v36, %v314_v30 }
 0x234   :  { %321 = vadd.xlane.f32.xlu0 %v320_v63 }
 0x260   :  { %s367_s2 = spop %366 }
 0x2b9   :  { %v180_v27 = vpop.xlane.xlu0 %179 }
 0x2ba   :  { %v181_v28 = vrot.slane %v180_v27, 4 }
 0x2bc   :  { %v182_v29 = vadd.f32 %v181_v28, %v180_v27 }
 0x2bd   :  { %v322_v31 = vpop.xlane.xlu0 %321 }
 0x2be   :  { %v183_v32 = vrot.slane %v182_v29, 2  ;;  %v323_v33 = vrot.slane %v322_v31, 4 }
 0x2c0   :  { %v324_v34 = vadd.f32 %v323_v33, %v322_v31  ;;  %v184_v35 = vadd.f32 %v183_v32, %v182_v29 }
 0x2c2   :  { %v325_v37 = vrot.slane %v324_v34, 2  ;;  %v185_v38 = vrot.slane %v184_v35, 1 }
 0x2c4   :  { %v326_v39 = vadd.f32 %v325_v37, %v324_v34  ;;  %v186_v40 = vadd.f32 %v185_v38, %v184_v35 }
 0x2c6   :  { %368 = vpush %v186_v40  ;;  %v327_v42 = vrot.slane %v326_v39, 1 }
 0x2c7   :  { %370 = vpush %v316_v41 }
 0x2c8   :  { %v328_v43 = vadd.f32 %v327_v42, %v326_v39 }
 0x2ca   :  { %372 = vpush %v328_v43 }
 0x2f7   :  { %s369_s3 = spop %368 }
 0x2f8   :  { %s371_s7 = spop %370  ;;  %s188_s8 = ssub.f32 %s367_s2, %s369_s3 }
 0x2fb   :  { %s373_s9 = spop %372 }
 0x2fc   :  { %s330_s10 = ssub.f32 %s371_s7, %s373_s9 }
 0x2fe   :  { %s331_s11 = sadd.f32 %s330_s10, %s188_s8 }
 0x300   :  { %s332_s14 = smul.f32 0.0625, %s331_s11 }
 0x302   :  { %v333_v44 = vstv %s332_s14 }
 0x303   :  { %334 = vst [vmem:[#allocation10] sm:$0xff] %v333_v44 }
 0x304   :  { %488 = shalt.err (!%p485_p10)
}
 0x305   :  { %344 = dma.vmem_to_hbm [thread:$0]  %s342_s13, 128, %s572_s4, [#allocation4]  }
 0x306   :  { %503 = dma.done.wait [#allocation4], 128  }
 0x307   :  { %504 = vsyncadd [#allocation4], 4294967168 }
 0x308   :  { %348 = vsyncpa [#allocation3], 1 }
 0x309   :  { %349 = vsyncpa [#allocation6], 1 }
 0x30a   :  { %350 = vsyncpa [#allocation9], 1 }
 0x30b   :  { %351 = vsyncpa [#allocation4], 1 }

</bundles_post_ra>
